<compile_context>
chip_gen: v7x
topology: tpu7x:2x2x1
jax: 0.10.0
libtpu: 0.0.40
codegen_flags: <defaults>
</compile_context>

<pallas_src>
import functools

import jax
import jax.numpy as jnp
from jax.experimental import pallas as pl
from jax.experimental.pallas import tpu as pltpu


def _ncngcn_fused_kernel(adj_ref, x_ref, w1_ref, w2_ref, vecs_ref, out_ref,
                         *, ln, res, eps):
    """Fully fused 2-layer NCNGCN forward on one (small) graph.

    adj_ref : (N, N)    normalized dense adjacency, bf16
    x_ref   : (N, Fin)  node features, bf16
    w1_ref  : (Fin, H)  layer-0 GCN weight, bf16
    w2_ref  : (H, H)    layer-1 GCN weight, bf16
    vecs_ref: (4, H)    stacked f32 rows [b1, gamma1, beta1, b2]
    out_ref : (N, H)    f32 output
    """
    vecs = vecs_ref[...]
    b1, g1, be1, b2 = vecs[0:1], vecs[1:2], vecs[2:3], vecs[3:4]

    # ---- Layer 0: GCNConv -> LayerNorm -> ReLU (Dropout = identity at eval) ----
    # Reassociated: (adj @ x) @ W1 — the big N x N matmul emits only Fin (=16) columns.
    ax = jnp.dot(adj_ref[...], x_ref[...], preferred_element_type=jnp.float32)
    h = jnp.dot(ax.astype(w1_ref.dtype), w1_ref[...],
                preferred_element_type=jnp.float32) + b1
    if ln:
        mean = jnp.mean(h, axis=-1, keepdims=True)
        var = jnp.mean(h * h, axis=-1, keepdims=True) - mean * mean
        h = (h - mean) * jax.lax.rsqrt(var + eps)
        h = h * g1 + be1
    x1 = jnp.maximum(h, 0.0)          # stays resident on-chip; never hits HBM

    # ---- Layer 1: GCNConv -> Identity, residual add (res=True, dims match) ----
    xw2 = jnp.dot(x1.astype(w2_ref.dtype), w2_ref[...],
                  preferred_element_type=jnp.float32)
    # Re-read adj here (don't keep it live across the LN/ReLU section).
    h2 = jnp.dot(adj_ref[...], xw2.astype(adj_ref.dtype),
                 preferred_element_type=jnp.float32) + b2
    if res:
        h2 = h2 + x1

    out_ref[...] = h2.astype(out_ref.dtype)


def _prep_operands(x, adj, params):
    (w1, b1, g1, be1), (w2, b2, g2, be2) = params
    del g2, be2  # layer-1 lins is Identity
    # One small f32 constant operand instead of four tiny ones.
    vecs = jnp.concatenate([b1, g1, be1, b2], axis=0).astype(jnp.float32)
    return (adj.astype(jnp.bfloat16), x.astype(jnp.bfloat16),
            w1.astype(jnp.bfloat16), w2.astype(jnp.bfloat16), vecs)


def ncngcn_forward(x, adj, params, *, ln=True, res=True, eps=1e-5):
    """NCNGCN.forward (eval mode), num_layers=2, conv_fn='gcn', jk=False. Single graph."""
    n, f_in = x.shape
    w1, w2 = params[0][0], params[1][0]
    hid, out_ch = w1.shape[1], w2.shape[1]
    assert w2.shape[0] == hid
    apply_res = bool(res) and (out_ch == hid)   # residual only when dims match

    kernel = functools.partial(_ncngcn_fused_kernel, ln=ln, res=apply_res, eps=eps)
    vmem = pl.BlockSpec(memory_space=pltpu.MemorySpace.VMEM)

    # No grid: single invocation, whole working set (~60 KiB in bf16) lives in VMEM,
    # no pipelining prologue/epilogue or double-buffering for a 1-step grid.
    return pl.pallas_call(
        kernel,
        out_shape=jax.ShapeDtypeStruct((n, out_ch), jnp.float32),
        in_specs=[vmem, vmem, vmem, vmem, vmem],
        out_specs=vmem,
    )(*_prep_operands(x, adj, params))


def ncngcn_forward_batched(x, adj, params, *, ln=True, res=True, eps=1e-5):
    """Batched variant: x (B, N, F), adj (B, N, N); one graph per grid step.

    The batch axis is marked "parallel" so it shards across both TensorCores on v7x
    and pipelines adj DMA behind compute.
    """
    b, n, f_in = x.shape
    w1, w2 = params[0][0], params[1][0]
    hid, out_ch = w1.shape[1], w2.shape[1]
    apply_res = bool(res) and (out_ch == hid)

    kernel = functools.partial(_ncngcn_fused_kernel, ln=ln, res=apply_res, eps=eps)
    adj_b, x_b, w1_b, w2_b, vecs = _prep_operands(x, adj, params)

    return pl.pallas_call(
        kernel,
        out_shape=jax.ShapeDtypeStruct((b, n, out_ch), jnp.float32),
        grid=(b,),
        in_specs=[
            pl.BlockSpec((None, n, n), lambda i: (i, 0, 0)),      # adj[i]
            pl.BlockSpec((None, n, f_in), lambda i: (i, 0, 0)),   # x[i]
            pl.BlockSpec((f_in, hid), lambda i: (0, 0)),          # W1 (resident)
            pl.BlockSpec((hid, out_ch), lambda i: (0, 0)),        # W2 (resident)
            pl.BlockSpec((4, hid), lambda i: (0, 0)),             # [b1, g1, be1, b2]
        ],
        out_specs=pl.BlockSpec((None, n, out_ch), lambda i: (i, 0, 0)),
        compiler_params=pltpu.CompilerParams(
            dimension_semantics=("parallel",)),
    )(adj_b, x_b, w1_b, w2_b, vecs)


def ncngcn_reference(x, adj, params, *, ln=True, res=True, eps=1e-5):
    """Plain-JAX f32 reference mirroring the PyTorch forward (HIGHEST precision dots)."""
    (w1, b1, g1, be1), (w2, b2, g2, be2) = params
    dot = functools.partial(jnp.dot, precision=jax.lax.Precision.HIGHEST)
    h = dot(adj, dot(x, w1)) + b1
    if ln:
        mean = h.mean(-1, keepdims=True)
        var = ((h - mean) ** 2).mean(-1, keepdims=True)
        h = (h - mean) / jnp.sqrt(var + eps) * g1 + be1
    x1 = jnp.maximum(h, 0.0)
    h2 = dot(adj, dot(x1, w2)) + b2
    if res and h2.shape[-1] == x1.shape[-1]:
        h2 = h2 + x1
    return h2


if __name__ == "__main__":
    N, F_IN, HID, B = 128, 16, 32, 2       # out_channels == hidden for num_layers==2 path
    key = jax.random.PRNGKey(0)
    k_adj, k_x, k_w1, k_w2 = jax.random.split(key, 4)

    # Deterministic normalized adjacencies: A_hat = D^-1/2 (A + I) D^-1/2, one per graph.
    def make_adj(k):
        a = (jax.random.uniform(k, (N, N)) < 0.05).astype(jnp.float32)
        a = jnp.minimum(jnp.maximum(a, a.T) + jnp.eye(N, dtype=jnp.float32), 1.0)
        d_inv_sqrt = 1.0 / jnp.sqrt(a.sum(axis=1))
        return a * d_inv_sqrt[:, None] * d_inv_sqrt[None, :]

    adj_b = jnp.stack([make_adj(k) for k in jax.random.split(k_adj, B)])
    x_b = jax.random.normal(k_x, (B, N, F_IN), dtype=jnp.float32)

    # Parameter init (glorot-like scaled normals; GCNConv bias=0; LN gamma=1, beta=0).
    w1 = jax.random.normal(k_w1, (F_IN, HID), dtype=jnp.float32) / jnp.sqrt(F_IN)
    b1 = jnp.zeros((1, HID), jnp.float32)
    g1 = jnp.ones((1, HID), jnp.float32)
    be1 = jnp.zeros((1, HID), jnp.float32)

    w2 = jax.random.normal(k_w2, (HID, HID), dtype=jnp.float32) / jnp.sqrt(HID)
    b2 = jnp.zeros((1, HID), jnp.float32)
    g2 = jnp.ones((1, HID), jnp.float32)
    be2 = jnp.zeros((1, HID), jnp.float32)

    params = ((w1, b1, g1, be1), (w2, b2, g2, be2))

    # Reference is evaluated on the same bf16-rounded matmul operands the kernel sees,
    # so the only residual mismatch is the kernel's internal bf16 intermediate rounding.
    rnd = lambda a: a.astype(jnp.bfloat16).astype(jnp.float32)
    params_ref = ((rnd(w1), b1, g1, be1), (rnd(w2), b2, g2, be2))

    # --- Single-graph fused kernel (no grid) ---
    out0 = jax.block_until_ready(ncngcn_forward(x_b[0], adj_b[0], params, ln=True, res=True))
    ref0 = ncngcn_reference(rnd(x_b[0]), rnd(adj_b[0]), params_ref, ln=True, res=True)
    assert out0.shape == (N, HID)
    assert jnp.allclose(out0, ref0, rtol=2e-2, atol=2e-2), "single-graph mismatch vs reference"

    # --- Batched kernel (parallel grid over graphs) ---
    out_b = jax.block_until_ready(ncngcn_forward_batched(x_b, adj_b, params, ln=True, res=True))
    ref_b = jnp.stack([
        ncngcn_reference(rnd(x_b[i]), rnd(adj_b[i]), params_ref, ln=True, res=True)
        for i in range(B)
    ])
    assert out_b.shape == (B, N, HID)
    assert jnp.allclose(out_b, ref_b, rtol=2e-2, atol=2e-2), "batched mismatch vs reference"

    # TODO(synk): dropout / DropAdj / JK-weighted sum are training-time paths (jk=False, p=0
    # here) and are identities at inference, so they are not lowered into the kernel.
    print("KERNEL_OK")
</pallas_src>

<mosaic_0001>
module attributes {stable_mosaic.version = 11 : i64} {
  func.func @_ncngcn_fused_kernel(%arg0: memref<128x128xbf16, #tpu.memory_space<vmem>>, %arg1: memref<128x16xbf16, #tpu.memory_space<vmem>>, %arg2: memref<16x32xbf16, #tpu.memory_space<vmem>>, %arg3: memref<32x32xbf16, #tpu.memory_space<vmem>>, %arg4: memref<4x32xf32, #tpu.memory_space<vmem>>, %arg5: memref<128x32xf32, #tpu.memory_space<vmem>>) attributes {dimension_semantics = [], scalar_prefetch = 0 : i64, scratch_operands = 0 : i64, tpu.core_type = #tpu.core_type<tc>} {
    %c0 = arith.constant 0 : index
    %c0_0 = arith.constant 0 : index
    %0 = vector.load %arg4[%c0, %c0_0] : memref<4x32xf32, #tpu.memory_space<vmem>>, vector<4x32xf32>
    %1 = vector.extract_strided_slice %0 {offsets = [0, 0], sizes = [1, 32], strides = [1, 1]} : vector<4x32xf32> to vector<1x32xf32>
    %2 = vector.extract_strided_slice %0 {offsets = [1, 0], sizes = [1, 32], strides = [1, 1]} : vector<4x32xf32> to vector<1x32xf32>
    %3 = vector.extract_strided_slice %0 {offsets = [2, 0], sizes = [1, 32], strides = [1, 1]} : vector<4x32xf32> to vector<1x32xf32>
    %4 = vector.extract_strided_slice %0 {offsets = [3, 0], sizes = [1, 32], strides = [1, 1]} : vector<4x32xf32> to vector<1x32xf32>
    %c0_1 = arith.constant 0 : index
    %c0_2 = arith.constant 0 : index
    %5 = vector.load %arg0[%c0_1, %c0_2] : memref<128x128xbf16, #tpu.memory_space<vmem>>, vector<128x128xbf16>
    %c0_3 = arith.constant 0 : index
    %c0_4 = arith.constant 0 : index
    %6 = vector.load %arg1[%c0_3, %c0_4] : memref<128x16xbf16, #tpu.memory_space<vmem>>, vector<128x16xbf16>
    %cst = arith.constant dense<0.000000e+00> : vector<128x16xf32>
    %7 = tpu.matmul %5, %6, %cst {dimension_numbers = #tpu.dot_dimension_numbers<[1], [0], [0], [1], [0, 0, 1, 1], [], []>} : vector<128x128xbf16>, vector<128x16xbf16>, vector<128x16xf32> -> vector<128x16xf32>
    %8 = arith.truncf %7 : vector<128x16xf32> to vector<128x16xbf16>
    %c0_5 = arith.constant 0 : index
    %c0_6 = arith.constant 0 : index
    %9 = vector.load %arg2[%c0_5, %c0_6] : memref<16x32xbf16, #tpu.memory_space<vmem>>, vector<16x32xbf16>
    %cst_7 = arith.constant dense<0.000000e+00> : vector<128x32xf32>
    %10 = tpu.matmul %8, %9, %cst_7 {dimension_numbers = #tpu.dot_dimension_numbers<[1], [0], [0], [1], [0, 0, 1, 1], [], []>} : vector<128x16xbf16>, vector<16x32xbf16>, vector<128x32xf32> -> vector<128x32xf32>
    %11 = vector.broadcast %1 : vector<1x32xf32> to vector<128x32xf32>
    %12 = arith.addf %10, %11 : vector<128x32xf32>
    %cst_8 = arith.constant dense<0.000000e+00> : vector<128xf32>
    %13 = vector.multi_reduction <add>, %12, %cst_8 [1] : vector<128x32xf32> to vector<128xf32>
    %14 = vector.shape_cast %13 : vector<128xf32> to vector<128x1xf32>
    %cst_9 = arith.constant 3.200000e+01 : f32
    %15 = vector.broadcast %cst_9 : f32 to vector<128x1xf32>
    %16 = arith.divf %14, %15 : vector<128x1xf32>
    %17 = arith.mulf %12, %12 : vector<128x32xf32>
    %cst_10 = arith.constant dense<0.000000e+00> : vector<128xf32>
    %18 = vector.multi_reduction <add>, %17, %cst_10 [1] : vector<128x32xf32> to vector<128xf32>
    %19 = vector.shape_cast %18 : vector<128xf32> to vector<128x1xf32>
    %cst_11 = arith.constant 3.200000e+01 : f32
    %20 = vector.broadcast %cst_11 : f32 to vector<128x1xf32>
    %21 = arith.divf %19, %20 : vector<128x1xf32>
    %22 = arith.mulf %16, %16 : vector<128x1xf32>
    %23 = arith.subf %21, %22 : vector<128x1xf32>
    %24 = vector.broadcast %16 : vector<128x1xf32> to vector<128x32xf32>
    %25 = arith.subf %12, %24 : vector<128x32xf32>
    %cst_12 = arith.constant 9.99999974E-6 : f32
    %26 = vector.broadcast %cst_12 : f32 to vector<128x1xf32>
    %27 = arith.addf %23, %26 : vector<128x1xf32>
    %28 = math.rsqrt %27 : vector<128x1xf32>
    %29 = vector.broadcast %28 : vector<128x1xf32> to vector<128x32xf32>
    %30 = arith.mulf %25, %29 : vector<128x32xf32>
    %31 = vector.broadcast %2 : vector<1x32xf32> to vector<128x32xf32>
    %32 = arith.mulf %30, %31 : vector<128x32xf32>
    %33 = vector.broadcast %3 : vector<1x32xf32> to vector<128x32xf32>
    %34 = arith.addf %32, %33 : vector<128x32xf32>
    %cst_13 = arith.constant 0.000000e+00 : f32
    %35 = vector.broadcast %cst_13 : f32 to vector<128x32xf32>
    %36 = arith.maximumf %34, %35 : vector<128x32xf32>
    %37 = arith.truncf %36 : vector<128x32xf32> to vector<128x32xbf16>
    %c0_14 = arith.constant 0 : index
    %c0_15 = arith.constant 0 : index
    %38 = vector.load %arg3[%c0_14, %c0_15] : memref<32x32xbf16, #tpu.memory_space<vmem>>, vector<32x32xbf16>
    %cst_16 = arith.constant dense<0.000000e+00> : vector<128x32xf32>
    %39 = tpu.matmul %37, %38, %cst_16 {dimension_numbers = #tpu.dot_dimension_numbers<[1], [0], [0], [1], [0, 0, 1, 1], [], []>} : vector<128x32xbf16>, vector<32x32xbf16>, vector<128x32xf32> -> vector<128x32xf32>
    %c0_17 = arith.constant 0 : index
    %c0_18 = arith.constant 0 : index
    %40 = vector.load %arg0[%c0_17, %c0_18] : memref<128x128xbf16, #tpu.memory_space<vmem>>, vector<128x128xbf16>
    %41 = arith.truncf %39 : vector<128x32xf32> to vector<128x32xbf16>
    %cst_19 = arith.constant dense<0.000000e+00> : vector<128x32xf32>
    %42 = tpu.matmul %40, %41, %cst_19 {dimension_numbers = #tpu.dot_dimension_numbers<[1], [0], [0], [1], [0, 0, 1, 1], [], []>} : vector<128x128xbf16>, vector<128x32xbf16>, vector<128x32xf32> -> vector<128x32xf32>
    %43 = vector.broadcast %4 : vector<1x32xf32> to vector<128x32xf32>
    %44 = arith.addf %42, %43 : vector<128x32xf32>
    %45 = arith.addf %44, %36 : vector<128x32xf32>
    %c0_20 = arith.constant 0 : index
    %c0_21 = arith.constant 0 : index
    %46 = vector.load %arg5[%c0_20, %c0_21] : memref<128x32xf32, #tpu.memory_space<vmem>>, vector<128x32xf32>
    tpu.vector_store %arg5[%c0_20, %c0_21], %45 {strides = array<i32>} : memref<128x32xf32, #tpu.memory_space<vmem>>, vector<128x32xf32>,
    return
  }
}

</mosaic_0001>

<bundles_post_ra>
// kernel: tpu_custom_call.1
= control target key start
LH: loop header
LB: loop body
LE: loop exit
PB: predicated region body
PF: predicated region fallthrough
CT: control target
= control target key end

     0   :  { %10 = vsyncpa [#allocation3], 0  ;;  %s1274_s18 = smov [#allocation2]   ;;  %s1850_s0 = inlined_call_operand.vmem [shape: bf16[128,128], index: 0, kind: input, shape index: {}]   ;;  %s1851_s1 = inlined_call_operand.vmem [shape: bf16[128,16], index: 1, kind: input, shape index: {}]   ;;  %s1852_s2 = inlined_call_operand.hbm [shape: bf16[16,32], index: 2, kind: input, shape index: {}]   ;;  %s1853_s3 = inlined_call_operand.vmem [shape: bf16[32,32], index: 3, kind: input, shape index: {}]   ;;  %s1854_s4 = inlined_call_operand.vmem [shape: f32[4,32], index: 4, kind: input, shape index: {}]   ;;  %s1855_s5 = inlined_call_operand.vmem [shape: f32[128,32], index: 5, kind: output, shape index: {}]  }
   0x1   :  { %s20_s19 = sshll.u32 %s1274_s18, 4  ;;  %s1250_s22 = scalar_lea.hbm %s1852_s2, 128  ;;  %s21_s19 = int_to_ptr.vmem [resolvable:$true] %s20_s19 }
   0x2   :  { %p1251_p0 = scmp.ne.s32.totalorder %s1852_s2, %s1250_s22  ;;  %p1254_p1 = scmp.lt.u32.totalorder %s1250_s22, %s1852_s2 }
   0x4   :  { %p1256_p2 = pnand %p1254_p1, %p1251_p0 }
   0x6   :  { %1259 = shalt.err (!%p1256_p2)
}
   0x7   :  { %s1260_s27 = scalar_lea.vmem %s21_s19, 128  ;;  %p1265_p4 = scmp.lt.s32.totalorder %s21_s19, %s21_s19 }
   0x8   :  { %p1261_p3 = scmp.ne.s32.totalorder %s21_s19, %s1260_s27  ;;  %p1266_p5 = scmp.lt.s32.totalorder %s1260_s27, %s1260_s27 }
   0xa   :  { %p1267_p6 = por %p1266_p5, %p1265_p4 }
   0xc   :  { %p1268_p7 = pnand %p1267_p6, %p1261_p3 }
   0xe   :  { %1271 = shalt.err (!%p1268_p7)
}
   0xf   :  { %s1275_s28 = smov 64   ;;  %s1276_s29 = smov 4  }
  0x10   :  { %26 = dma.hbm_to_vmem [thread:$0]  %s1852_s2, 128, %s21_s19, [#allocation3], %s1275_s28, %s1275_s28, %s1276_s29  }
  0x11   :  { %1272 = dma.done.wait [#allocation3], 128  }
  0x12   :  { %1273 = vsyncadd [#allocation3], 4294967168  ;;  %v1199_v0 = vld [vmem:[%s1851_s1] sm:$0xff]   ;;  %v1200_v1 = vld [vmem:[%s1851_s1 + $0x8] sm:$0xff]   ;;  %vm281_vm0 = vcmask 130048   ;;  %v271_v41 = vlaneseq  ;;  %vm403_vm1 = vcmask 261120  }
  0x13   :  { %1078 = vmatprep.subr.bf16.mxu0 %v1199_v0  ;;  %v1201_v2 = vld [vmem:[%s1851_s1 + $0x10] sm:$0xff]   ;;  %v1202_v3 = vld [vmem:[%s1851_s1 + $0x18] sm:$0xff]   ;;  %v1207_v4 = vld [vmem:[%s1850_s0] sm:$0xff]  }
  0x14   :  { %1079 = vmatpush3.bf16.msra.mxu0 %v1199_v0  ;;  %1094 = vmatprep.mubr.bf16.mxu0 %v1207_v4  ;;  %v1203_v5 = vld [vmem:[%s1851_s1 + $0x20] sm:$0xff]   ;;  %v1204_v6 = vld [vmem:[%s1851_s1 + $0x28] sm:$0xff]   ;;  %v1205_v7 = vld [vmem:[%s1851_s1 + $0x30] sm:$0xff]   ;;  %v1396_v42 = vshrl.u32 %v271_v41, 7 }
  0x15   :  { %1080 = vmatprep.subr.bf16.mxu0 %v1200_v1  ;;  %v1206_v8 = vld [vmem:[%s1851_s1 + $0x38] sm:$0xff]   ;;  %v1349_v9 = vld [vmem:[%s1850_s0 + $0x8] sm:$0xff]   ;;  %v1354_v10 = vld [vmem:[%s1850_s0 + $0x10] sm:$0xff]  }
  0x16   :  { %v1361_v11 = vld [vmem:[%s1850_s0 + $0x18] sm:$0xff]   ;;  %v1366_v12 = vld [vmem:[%s1850_s0 + $0x20] sm:$0xff]   ;;  %v1373_v13 = vld [vmem:[%s1850_s0 + $0x28] sm:$0xff]   ;;  %v273_v43 = vsub.s32 0, %v1396_v42 }
  0x17   :  { %v1378_v14 = vld [vmem:[%s1850_s0 + $0x30] sm:$0xff]   ;;  %v1385_v15 = vld [vmem:[%s1850_s0 + $0x38] sm:$0xff]   ;;  %v1215_v16 = vld [vmem:[#allocation2] sm:$0xff]  }
  0x18   :  { %1081 = vmatpush3.bf16.msra.mxu0 %v1200_v1  ;;  %1110 = vmatprep.subr.bf16.mxu1 %v1215_v16  ;;  %v1402_v44 = vld [vmem:[%s1854_s4] sm:$0xf] }
  0x19   :  { %1082 = vmatprep.subr.bf16.mxu0 %v1201_v2  ;;  %1111 = vmatpush3.bf16.msra.mxu1 %v1215_v16  ;;  %v1405_v45 = vrot.slane %v1402_v44, %v273_v43 }
  0x1c   :  { %1083 = vmatpush3.bf16.msra.mxu0 %v1201_v2 }
  0x1d   :  { %1084 = vmatprep.subr.bf16.mxu0 %v1202_v3 }
  0x20   :  { %1085 = vmatpush3.bf16.msra.mxu0 %v1202_v3 }
  0x21   :  { %1086 = vmatprep.subr.bf16.mxu0 %v1203_v5 }
  0x24   :  { %1087 = vmatpush3.bf16.msra.mxu0 %v1203_v5 }
  0x25   :  { %1088 = vmatprep.subr.bf16.mxu0 %v1204_v6 }
  0x28   :  { %1089 = vmatpush3.bf16.msra.mxu0 %v1204_v6 }
  0x29   :  { %1090 = vmatprep.subr.bf16.mxu0 %v1205_v7 }
  0x2c   :  { %1091 = vmatpush3.bf16.msra.mxu0 %v1205_v7 }
  0x2d   :  { %1092 = vmatprep.subr.bf16.mxu0 %v1206_v8 }
  0x30   :  { %1093 = vmatpush3.bf16.msra.mxu0 %v1206_v8 }
  0x33   :  { %1095 = vmatmul.mubr.bf16.vlgmr.msra.gmra.mrb[0].mxu0 %v1349_v9 }
  0x34   :  { %1098 = vmatprep.mubr.bf16.mxu0 %v1354_v10 }
  0x3b   :  { %1099 = vmatmul.mubr.bf16.gmra.mrb[4].mxu0 %v1361_v11 }
  0x3c   :  { %1102 = vmatprep.mubr.bf16.mxu0 %v1366_v12 }
  0x43   :  { %1103 = vmatmul.mubr.bf16.gmra.mrb[8].mxu0 %v1373_v13 }
  0x44   :  { %1106 = vmatprep.mubr.bf16.mxu0 %v1378_v14 }
  0x4b   :  { %1107 = vmatmul.mubr.bf16.gmra.mrb[12].mxu0 %v1385_v15 }
  0x4c   :  { %1164 = vmatprep.mubr.bf16.mxu0 %v1207_v4 }
 0x106   :  { %v1096_v17 = vpop.f32.mrb[0].mxu0 }
 0x107   :  { %v198_v18 = vpop.f32.mrb[1].mxu0 }
 0x108   :  { %v1097_v19 = vpop.f32.mrb[2].mxu0 }
 0x109   :  { %v262_v20 = vpack.c.bf16 %v1097_v19, %v1096_v17  ;;  %v201_v21 = vpop.f32.mrb[3].mxu0 }
 0x10a   :  { %v261_v22 = vpack.c.bf16 %v201_v21, %v198_v18 }
 0x10c   :  { %1112 = vmatprep.mubr.msk.bf16.mxu1 %vm281_vm0, %v261_v22 }
 0x10d   :  { %1113 = vmatmul.mubr.msk.bf16.vlgmr.msra.gmra.mrb[0].mxu1 %vm281_vm0, %v262_v20 }
 0x10e   :  { %v1100_v23 = vpop.f32.mrb[4].mxu0 }
 0x10f   :  { %v214_v24 = vpop.f32.mrb[5].mxu0 }
 0x110   :  { %v1101_v25 = vpop.f32.mrb[6].mxu0 }
 0x111   :  { %v264_v26 = vpack.c.bf16 %v1101_v25, %v1100_v23  ;;  %v217_v27 = vpop.f32.mrb[7].mxu0 }
 0x112   :  { %v263_v28 = vpack.c.bf16 %v217_v27, %v214_v24 }
 0x114   :  { %1116 = vmatprep.mubr.msk.bf16.mxu1 %vm281_vm0, %v263_v28 }
 0x115   :  { %1117 = vmatmul.mubr.msk.bf16.gmra.mrb[4].mxu1 %vm281_vm0, %v264_v26 }
 0x116   :  { %v1104_v29 = vpop.f32.mrb[8].mxu0 }
 0x117   :  { %v230_v30 = vpop.f32.mrb[9].mxu0 }
 0x118   :  { %v1105_v31 = vpop.f32.mrb[10].mxu0 }
 0x119   :  { %v266_v32 = vpack.c.bf16 %v1105_v31, %v1104_v29  ;;  %v233_v33 = vpop.f32.mrb[11].mxu0 }
 0x11a   :  { %v265_v34 = vpack.c.bf16 %v233_v33, %v230_v30 }
 0x11c   :  { %1120 = vmatprep.mubr.msk.bf16.mxu1 %vm281_vm0, %v265_v34 }
 0x11d   :  { %1121 = vmatmul.mubr.msk.bf16.gmra.mrb[8].mxu1 %vm281_vm0, %v266_v32 }
 0x11e   :  { %v1108_v35 = vpop.f32.mrb[12].mxu0 }
 0x11f   :  { %v246_v36 = vpop.f32.mrb[13].mxu0 }
 0x120   :  { %v1109_v37 = vpop.f32.mrb[14].mxu0 }
 0x121   :  { %v268_v38 = vpack.c.bf16 %v1109_v37, %v1108_v35  ;;  %v249_v39 = vpop.f32.mrb[15].mxu0 }
 0x122   :  { %v267_v40 = vpack.c.bf16 %v249_v39, %v246_v36 }
 0x124   :  { %1124 = vmatprep.mubr.msk.bf16.mxu1 %vm281_vm0, %v267_v40 }
 0x125   :  { %1125 = vmatmul.mubr.msk.bf16.gmra.mrb[12].mxu1 %vm281_vm0, %v268_v38 }
 0x1e0   :  { %v1114_v46 = vpop.f32.mrb[0].mxu1 }
 0x1e1   :  { %v1408_v47 = vadd.f32 %v1114_v46, %v1405_v45  ;;  %v340_v48 = vpop.f32.mrb[1].mxu1 }
 0x1e2   :  { %v1411_v49 = vadd.f32 %v340_v48, %v1405_v45  ;;  %v1115_v50 = vpop.f32.mrb[2].mxu1 }
 0x1e3   :  { %v1414_v51 = vadd.f32 %v1115_v50, %v1405_v45  ;;  %v343_v52 = vpop.f32.mrb[3].mxu1  ;;  %v410_v53 = vsel %vm403_vm1, %v1408_v47, 0.0  ;;  %v471_v55 = vmul.f32 %v1408_v47, %v1408_v47 }
 0x1e4   :  { %411 = vadd.xlane.f32.xlu1 %v410_v53  ;;  %v404_v54 = vsel %vm403_vm1, %v1411_v49, 0.0  ;;  %v1423_v56 = vadd.f32 %v343_v52, %v1405_v45  ;;  %v469_v3 = vmul.f32 %v1411_v49, %v1411_v49 }
 0x1e5   :  { %405 = vadd.xlane.f32.xlu0 %v404_v54  ;;  %v413_v57 = vsel %vm403_vm1, %v1414_v51, 0.0  ;;  %v472_v58 = vmul.f32 %v1414_v51, %v1414_v51  ;;  %v491_v60 = vsel %vm403_vm1, %v471_v55, 0.0 }
 0x1e6   :  { %v470_v1 = vmul.f32 %v1423_v56, %v1423_v56  ;;  %v407_v2 = vsel %vm403_vm1, %v1423_v56, 0.0  ;;  %v485_v7 = vsel %vm403_vm1, %v469_v3, 0.0  ;;  %v1217_v3 = vld [vmem:[%s1853_s3 + $0x8] sm:$0xff]  }
 0x1e7   :  { %v494_v0 = vsel %vm403_vm1, %v472_v58, 0.0 }
 0x1e8   :  { %v1118_v59 = vpop.f32.mrb[4].mxu1  ;;  %414 = vadd.xlane.f32.xlu1 %v413_v57  ;;  %v488_v5 = vsel %vm403_vm1, %v470_v1, 0.0 }
 0x1e9   :  { %v356_v61 = vpop.f32.mrb[5].mxu1  ;;  %492 = vadd.xlane.f32.xlu0 %v491_v60  ;;  %v1442_v6 = vadd.f32 %v1118_v59, %v1405_v45 }
 0x1ea   :  { %v1119_v62 = vpop.f32.mrb[6].mxu1  ;;  %v1451_v21 = vadd.f32 %v356_v61, %v1405_v45 }
 0x1eb   :  { %v359_v63 = vpop.f32.mrb[7].mxu1  ;;  %v1438_v4 = vadd.f32 %v1119_v62, %v1405_v45  ;;  %v422_v22 = vsel %vm403_vm1, %v1442_v6, 0.0  ;;  %v475_v26 = vmul.f32 %v1442_v6, %v1442_v6  ;;  %v1216_v62 = vld [vmem:[%s1853_s3] sm:$0xff]  }
 0x1ec   :  { %495 = vadd.xlane.f32.xlu1 %v494_v0  ;;  %v1446_v18 = vadd.f32 %v359_v63, %v1405_v45  ;;  %v416_v25 = vsel %vm403_vm1, %v1451_v21, 0.0  ;;  %v473_v34 = vmul.f32 %v1451_v21, %v1451_v21  ;;  %1128 = vmatprep.subr.bf16.mxu1 %v1216_v62 }
 0x1ed   :  { %408 = vadd.xlane.f32.xlu0 %v407_v2  ;;  %v425_v19 = vsel %vm403_vm1, %v1438_v4, 0.0  ;;  %v476_v24 = vmul.f32 %v1438_v4, %v1438_v4  ;;  %v503_v33 = vsel %vm403_vm1, %v475_v26, 0.0  ;;  %1129 = vmatpush3.bf16.msra.mxu1 %v1216_v62 }
 0x1ee   :  { %v419_v23 = vsel %vm403_vm1, %v1446_v18, 0.0  ;;  %v474_v31 = vmul.f32 %v1446_v18, %v1446_v18  ;;  %v497_v38 = vsel %vm403_vm1, %v473_v34, 0.0  ;;  %1130 = vmatprep.subr.bf16.mxu1 %v1217_v3 }
 0x1ef   :  { %v506_v30 = vsel %vm403_vm1, %v476_v24, 0.0 }
 0x1f0   :  { %489 = vadd.xlane.f32.xlu1 %v488_v5  ;;  %v1122_v8 = vpop.f32.mrb[8].mxu1  ;;  %v500_v36 = vsel %vm403_vm1, %v474_v31, 0.0 }
 0x1f1   :  { %486 = vadd.xlane.f32.xlu0 %v485_v7  ;;  %v372_v16 = vpop.f32.mrb[9].mxu1  ;;  %v1474_v37 = vadd.f32 %v1122_v8, %v1405_v45  ;;  %1131 = vmatpush3.bf16.msra.mxu1 %v1217_v3 }
 0x1f2   :  { %v1123_v17 = vpop.f32.mrb[10].mxu1  ;;  %v1483_v41 = vadd.f32 %v372_v16, %v1405_v45 }
 0x1f3   :  { %v375_v20 = vpop.f32.mrb[11].mxu1  ;;  %v1470_v35 = vadd.f32 %v1123_v17, %v1405_v45  ;;  %v434_v43 = vsel %vm403_vm1, %v1474_v37, 0.0  ;;  %v479_v52 = vmul.f32 %v1474_v37, %v1474_v37 }
 0x1f4   :  { %426 = vadd.xlane.f32.xlu1 %v425_v19  ;;  %v1478_v39 = vadd.f32 %v375_v20, %v1405_v45  ;;  %v428_v50 = vsel %vm403_vm1, %v1483_v41, 0.0  ;;  %v477_v57 = vmul.f32 %v1483_v41, %v1483_v41 }
 0x1f5   :  { %423 = vadd.xlane.f32.xlu0 %v422_v22  ;;  %v437_v40 = vsel %vm403_vm1, %v1470_v35, 0.0  ;;  %v480_v48 = vmul.f32 %v1470_v35, %v1470_v35  ;;  %v515_v55 = vsel %vm403_vm1, %v479_v52, 0.0 }
 0x1f6   :  { %v431_v46 = vsel %vm403_vm1, %v1478_v39, 0.0  ;;  %v478_v54 = vmul.f32 %v1478_v39, %v1478_v39  ;;  %v509_v61 = vsel %vm403_vm1, %v477_v57, 0.0 }
 0x1f7   :  { %v518_v53 = vsel %vm403_vm1, %v480_v48, 0.0 }
 0x1f8   :  { %420 = vadd.xlane.f32.xlu1 %v419_v23  ;;  %v1126_v27 = vpop.f32.mrb[12].mxu1  ;;  %v512_v59 = vsel %vm403_vm1, %v478_v54, 0.0 }
 0x1f9   :  { %417 = vadd.xlane.f32.xlu0 %v416_v25  ;;  %v388_v28 = vpop.f32.mrb[13].mxu1  ;;  %v1506_v60 = vadd.f32 %v1126_v27, %v1405_v45 }
 0x1fa   :  { %v1127_v29 = vpop.f32.mrb[14].mxu1  ;;  %v1518_v1 = vadd.f32 %v388_v28, %v1405_v45 }
 0x1fb   :  { %v391_v32 = vpop.f32.mrb[15].mxu1  ;;  %v1502_v58 = vadd.f32 %v1127_v29, %v1405_v45  ;;  %v446_v2 = vsel %vm403_vm1, %v1506_v60, 0.0  ;;  %v483_v20 = vmul.f32 %v1506_v60, %v1506_v60 }
 0x1fc   :  { %507 = vadd.xlane.f32.xlu1 %v506_v30  ;;  %v1513_v63 = vadd.f32 %v391_v32, %v1405_v45  ;;  %v440_v45 = vsel %vm403_vm1, %v1518_v1, 0.0  ;;  %v481_v8 = vmul.f32 %v1518_v1, %v1518_v1 }
 0x1fd   :  { %504 = vadd.xlane.f32.xlu0 %v503_v33  ;;  %v449_v0 = vsel %vm403_vm1, %v1502_v58, 0.0  ;;  %v484_v17 = vmul.f32 %v1502_v58, %v1502_v58  ;;  %v527_v23 = vsel %vm403_vm1, %v483_v20, 0.0  ;;  %v667_v20 = vsub.s32 2, %v1396_v42 }
 0x1fe   :  { %v443_v5 = vsel %vm403_vm1, %v1513_v63, 0.0  ;;  %v482_v7 = vmul.f32 %v1513_v63, %v1513_v63  ;;  %v521_v19 = vsel %vm403_vm1, %v481_v8, 0.0 }
 0x1ff   :  { %v530_v22 = vsel %vm403_vm1, %v484_v17, 0.0 }
 0x200   :  { %501 = vadd.xlane.f32.xlu1 %v500_v36  ;;  %v524_v16 = vsel %vm403_vm1, %v482_v7, 0.0  ;;  %v647_v7 = vsub.s32 1, %v1396_v42 }
 0x201   :  { %498 = vadd.xlane.f32.xlu0 %v497_v38 }
 0x204   :  { %438 = vadd.xlane.f32.xlu1 %v437_v40 }
 0x205   :  { %435 = vadd.xlane.f32.xlu0 %v434_v43 }
 0x208   :  { %432 = vadd.xlane.f32.xlu1 %v431_v46 }
 0x209   :  { %429 = vadd.xlane.f32.xlu0 %v428_v50 }
 0x20c   :  { %519 = vadd.xlane.f32.xlu1 %v518_v53 }
 0x20d   :  { %516 = vadd.xlane.f32.xlu0 %v515_v55 }
 0x210   :  { %513 = vadd.xlane.f32.xlu1 %v512_v59 }
 0x211   :  { %510 = vadd.xlane.f32.xlu0 %v509_v61 }
 0x214   :  { %450 = vadd.xlane.f32.xlu1 %v449_v0 }
 0x215   :  { %447 = vadd.xlane.f32.xlu0 %v446_v2 }
 0x218   :  { %444 = vadd.xlane.f32.xlu1 %v443_v5 }
 0x219   :  { %441 = vadd.xlane.f32.xlu0 %v440_v45 }
 0x21c   :  { %525 = vadd.xlane.f32.xlu1 %v524_v16 }
 0x21d   :  { %522 = vadd.xlane.f32.xlu0 %v521_v19 }
 0x220   :  { %531 = vadd.xlane.f32.xlu1 %v530_v22  ;;  %v1552_v22 = vrot.slane %v1402_v44, %v647_v7 }
 0x221   :  { %528 = vadd.xlane.f32.xlu0 %v527_v23 }
 0x271   :  { %v412_v24 = vpop.xlane.xlu1 %411 }
 0x272   :  { %v406_v25 = vpop.xlane.xlu0 %405  ;;  %v455_v26 = vmul.f32 0.03125, %v412_v24 }
 0x273   :  { %v1541_v40 = vmul.f32 0.03125, %v406_v25 }
 0x274   :  { %v551_v30 = vmul.f32 %v455_v26, %v455_v26  ;;  %v583_v23 = vsub.f32 %v1408_v47, %v455_v26  ;;  %v1565_v47 = vrot.slane %v1402_v44, %v667_v20 }
 0x275   :  { %v415_v27 = vpop.xlane.xlu1 %414  ;;  %v549_v57 = vmul.f32 %v1541_v40, %v1541_v40  ;;  %v581_v26 = vsub.f32 %v1411_v49, %v1541_v40 }
 0x276   :  { %v456_v28 = vmul.f32 0.03125, %v415_v27  ;;  %v493_v29 = vpop.xlane.xlu0 %492 }
 0x277   :  { %v535_v31 = vmul.f32 0.03125, %v493_v29 }
 0x278   :  { %v552_v34 = vmul.f32 %v456_v28, %v456_v28  ;;  %v584_v24 = vsub.f32 %v1414_v51, %v456_v28 }
 0x279   :  { %v567_v32 = vsub.f32 %v535_v31, %v551_v30  ;;  %v496_v33 = vpop.xlane.xlu1 %495 }
 0x27a   :  { %v536_v36 = vmul.f32 0.03125, %v496_v33  ;;  %v409_v38 = vpop.xlane.xlu0 %408 }
 0x27b   :  { %v599_v43 = vadd.f32 1e-05, %v567_v32  ;;  %v454_v46 = vmul.f32 0.03125, %v409_v38 }
 0x27c   :  { %v568_v48 = vsub.f32 %v536_v36, %v552_v34 }
 0x27d   :  { %v550_v50 = vmul.f32 %v454_v46, %v454_v46  ;;  %v490_v52 = vpop.xlane.xlu1 %489  ;;  %1218 = vrsqrt.f32 %v599_v43 }
 0x27e   :  { %v600_v53 = vadd.f32 1e-05, %v568_v48  ;;  %v534_v54 = vmul.f32 0.03125, %v490_v52  ;;  %v487_v55 = vpop.xlane.xlu0 %486  ;;  %v582_v48 = vsub.f32 %v1423_v56, %v454_v46 }
 0x27f   :  { %v533_v59 = vmul.f32 0.03125, %v487_v55 }
 0x280   :  { %1220 = vrsqrt.f32 %v600_v53  ;;  %v566_v61 = vsub.f32 %v534_v54, %v550_v50 }
 0x281   :  { %v565_v62 = vsub.f32 %v533_v59, %v549_v57  ;;  %v427_v0 = vpop.xlane.xlu1 %426 }
 0x282   :  { %v598_v2 = vadd.f32 1e-05, %v566_v61  ;;  %v424_v3 = vpop.xlane.xlu0 %423  ;;  %v1546_v8 = vmul.f32 0.03125, %v427_v0 }
 0x283   :  { %v597_v5 = vadd.f32 1e-05, %v565_v62  ;;  %v1548_v17 = vmul.f32 0.03125, %v424_v3 }
 0x284   :  { %1222 = vrsqrt.f32 %v598_v2  ;;  %v556_v29 = vmul.f32 %v1546_v8, %v1546_v8 }
 0x285   :  { %1224 = vrsqrt.f32 %v597_v5  ;;  %v421_v45 = vpop.xlane.xlu1 %420  ;;  %v555_v38 = vmul.f32 %v1548_v17, %v1548_v17 }
 0x286   :  { %v418_v16 = vpop.xlane.xlu0 %417  ;;  %v1558_v30 = vmul.f32 0.03125, %v421_v45 }
 0x287   :  { %v1219_v19 = vpop.eup %1218  ;;  %v1560_v31 = vmul.f32 0.03125, %v418_v16 }
 0x288   :  { %v631_v34 = vmul.f32 %v1219_v19, %v583_v23  ;;  %v554_v54 = vmul.f32 %v1558_v30, %v1558_v30 }
 0x289   :  { %v508_v25 = vpop.xlane.xlu1 %507  ;;  %v553_v55 = vmul.f32 %v1560_v31, %v1560_v31 }
 0x28a   :  { %v1221_v27 = vpop.eup %1220  ;;  %v540_v32 = vmul.f32 0.03125, %v508_v25  ;;  %v505_v33 = vpop.xlane.xlu0 %504  ;;  %v651_v0 = vmul.f32 %v1552_v22, %v631_v34 }
 0x28b   :  { %v632_v36 = vmul.f32 %v1221_v27, %v584_v24  ;;  %v539_v43 = vmul.f32 0.03125, %v505_v33 }
 0x28c   :  { %v572_v51 = vsub.f32 %v540_v32, %v556_v29  ;;  %v1582_v23 = vadd.f32 %v1565_v47, %v651_v0 }
 0x28d   :  { %v652_v28 = vmul.f32 %v1552_v22, %v632_v36  ;;  %v571_v50 = vsub.f32 %v539_v43, %v555_v38  ;;  %v502_v52 = vpop.xlane.xlu1 %501 }
 0x28e   :  { %v1223_v53 = vpop.eup %1222  ;;  %v604_v57 = vadd.f32 1e-05, %v572_v51  ;;  %v538_v59 = vmul.f32 0.03125, %v502_v52  ;;  %v499_v61 = vpop.xlane.xlu0 %498  ;;  %v687_v43 = vmax.f32 %v1582_v23, 0.0 }
 0x28f   :  { %v1225_v62 = vpop.eup %1224  ;;  %v603_v49 = vadd.f32 1e-05, %v571_v50  ;;  %v537_v40 = vmul.f32 0.03125, %v499_v61  ;;  %v630_v2 = vmul.f32 %v1223_v53, %v582_v48  ;;  %v1577_v3 = vadd.f32 %v1565_v47, %v652_v28 }
 0x290   :  { %1226 = vrsqrt.f32 %v604_v57  ;;  %v570_v56 = vsub.f32 %v538_v59, %v554_v54  ;;  %v629_v46 = vmul.f32 %v1225_v62, %v581_v26  ;;  %v588_v28 = vsub.f32 %v1438_v4, %v1546_v8 }
 0x291   :  { %1228 = vrsqrt.f32 %v603_v49  ;;  %v569_v5 = vsub.f32 %v537_v40, %v553_v55  ;;  %v439_v7 = vpop.xlane.xlu1 %438  ;;  %v650_v45 = vmul.f32 %v1552_v22, %v630_v2  ;;  %v688_v29 = vmax.f32 %v1577_v3, 0.0 }
 0x292   :  { %v602_v16 = vadd.f32 1e-05, %v570_v56  ;;  %v436_v19 = vpop.xlane.xlu0 %435  ;;  %v649_v20 = vmul.f32 %v1552_v22, %v629_v46  ;;  %v1592_v34 = vmul.f32 0.03125, %v439_v7  ;;  %v587_v53 = vsub.f32 %v1442_v6, %v1548_v17 }
 0x293   :  { %v601_v24 = vadd.f32 1e-05, %v569_v5  ;;  %v1585_v25 = vadd.f32 %v1565_v47, %v650_v45  ;;  %v1596_v51 = vmul.f32 0.03125, %v436_v19  ;;  %v702_v50 = vpack.c.bf16 %v688_v29, %v687_v43 }
 0x294   :  { %1230 = vrsqrt.f32 %v602_v16  ;;  %v1588_v27 = vadd.f32 %v1565_v47, %v649_v20  ;;  %v560_v54 = vmul.f32 %v1592_v34, %v1592_v34  ;;  %v586_v49 = vsub.f32 %v1446_v18, %v1558_v30 }
 0x295   :  { %1232 = vrsqrt.f32 %v601_v24  ;;  %v433_v32 = vpop.xlane.xlu1 %432  ;;  %v686_v33 = vmax.f32 %v1585_v25, 0.0  ;;  %v559_v8 = vmul.f32 %v1596_v51, %v1596_v51  ;;  %v585_v40 = vsub.f32 %v1451_v21, %v1560_v31 }
 0x296   :  { %v430_v36 = vpop.xlane.xlu0 %429  ;;  %v685_v38 = vmax.f32 %v1588_v27, 0.0  ;;  %v1612_v55 = vmul.f32 0.03125, %v433_v32 }
 0x297   :  { %v1617_v61 = vmul.f32 0.03125, %v430_v36 }
 0x298   :  { %v701_v26 = vpack.c.bf16 %v686_v33, %v685_v38  ;;  %v558_v7 = vmul.f32 %v1612_v55, %v1612_v55 }
 0x299   :  { %v520_v48 = vpop.xlane.xlu1 %519  ;;  %v557_v18 = vmul.f32 %v1617_v61, %v1617_v61 }
 0x29a   :  { %v1227_v52 = vpop.eup %1226  ;;  %v544_v57 = vmul.f32 0.03125, %v520_v48  ;;  %1132 = vmatprep.mubr.msk.bf16.mxu1 %vm403_vm1, %v701_v26  ;;  %v517_v59 = vpop.xlane.xlu0 %516 }
 0x29b   :  { %v1229_v4 = vpop.eup %1228  ;;  %v543_v62 = vmul.f32 0.03125, %v517_v59  ;;  %1133 = vmatmul.mubr.msk.bf16.vlgmr.msra.gmra.mrb[16].mxu1 %vm403_vm1, %v702_v50  ;;  %v636_v0 = vmul.f32 %v1227_v52, %v588_v28 }
 0x29c   :  { %v576_v6 = vsub.f32 %v544_v57, %v560_v54  ;;  %v635_v17 = vmul.f32 %v1229_v4, %v587_v53 }
 0x29d   :  { %v575_v2 = vsub.f32 %v543_v62, %v559_v8  ;;  %v514_v56 = vpop.xlane.xlu1 %513  ;;  %v656_v46 = vmul.f32 %v1552_v22, %v636_v0 }
 0x29e   :  { %v1231_v5 = vpop.eup %1230  ;;  %v608_v45 = vadd.f32 1e-05, %v576_v6  ;;  %v542_v16 = vmul.f32 0.03125, %v514_v56  ;;  %v511_v19 = vpop.xlane.xlu0 %510  ;;  %v655_v20 = vmul.f32 %v1552_v22, %v635_v17 }
 0x29f   :  { %v1233_v24 = vpop.eup %1232  ;;  %v607_v30 = vadd.f32 1e-05, %v575_v2  ;;  %v541_v32 = vmul.f32 0.03125, %v511_v19  ;;  %v634_v21 = vmul.f32 %v1231_v5, %v586_v49  ;;  %v1631_v26 = vadd.f32 %v1565_v47, %v656_v46 }
 0x2a0   :  { %1234 = vrsqrt.f32 %v608_v45  ;;  %v574_v31 = vsub.f32 %v542_v16, %v558_v7  ;;  %v633_v36 = vmul.f32 %v1233_v24, %v585_v40  ;;  %v1635_v52 = vadd.f32 %v1565_v47, %v655_v20 }
 0x2a1   :  { %1236 = vrsqrt.f32 %v607_v30  ;;  %v573_v28 = vsub.f32 %v541_v32, %v557_v18  ;;  %v451_v48 = vpop.xlane.xlu1 %450  ;;  %v654_v50 = vmul.f32 %v1552_v22, %v634_v21  ;;  %v692_v17 = vmax.f32 %v1631_v26, 0.0 }
 0x2a2   :  { %v606_v53 = vadd.f32 1e-05, %v574_v31  ;;  %v448_v54 = vpop.xlane.xlu0 %447  ;;  %v653_v57 = vmul.f32 %v1552_v22, %v633_v36  ;;  %v691_v6 = vmax.f32 %v1635_v52, 0.0  ;;  %v592_v5 = vsub.f32 %v1470_v35, %v1592_v34 }
 0x2a3   :  { %v605_v59 = vadd.f32 1e-05, %v573_v28  ;;  %v1639_v4 = vadd.f32 %v1565_v47, %v654_v50  ;;  %v591_v19 = vsub.f32 %v1474_v37, %v1596_v51  ;;  %v1664_v20 = vmul.f32 0.03125, %v451_v48 }
 0x2a4   :  { %1238 = vrsqrt.f32 %v606_v53  ;;  %v1642_v8 = vadd.f32 %v1565_v47, %v653_v57  ;;  %v704_v45 = vpack.c.bf16 %v692_v17, %v691_v6  ;;  %v467_v34 = vmul.f32 0.03125, %v448_v54 }
 0x2a5   :  { %1240 = vrsqrt.f32 %v605_v59  ;;  %v445_v62 = vpop.xlane.xlu1 %444  ;;  %v690_v0 = vmax.f32 %v1639_v4, 0.0  ;;  %v590_v51 = vsub.f32 %v1478_v39, %v1612_v55  ;;  %v589_v28 = vsub.f32 %v1483_v41, %v1617_v61 }
 0x2a6   :  { %v1647_v49 = vmul.f32 0.03125, %v445_v62  ;;  %v442_v40 = vpop.xlane.xlu0 %441  ;;  %v689_v2 = vmax.f32 %v1642_v8, 0.0  ;;  %v564_v57 = vmul.f32 %v1664_v20, %v1664_v20 }
 0x2a7   :  { %v1650_v56 = vmul.f32 0.03125, %v442_v40 }
 0x2a8   :  { %v703_v46 = vpack.c.bf16 %v690_v0, %v689_v2  ;;  %v562_v24 = vmul.f32 %v1647_v49, %v1647_v49 }
 0x2a9   :  { %v526_v7 = vpop.xlane.xlu1 %525  ;;  %v561_v32 = vmul.f32 %v1650_v56, %v1650_v56 }
 0x2aa   :  { %v1235_v16 = vpop.eup %1234  ;;  %v546_v18 = vmul.f32 0.03125, %v526_v7  ;;  %1136 = vmatprep.mubr.msk.bf16.mxu1 %vm403_vm1, %v703_v46  ;;  %v523_v30 = vpop.xlane.xlu0 %522  ;;  %v563_v7 = vmul.f32 %v467_v34, %v467_v34 }
 0x2ab   :  { %v1237_v35 = vpop.eup %1236  ;;  %v545_v21 = vmul.f32 0.03125, %v523_v30  ;;  %1137 = vmatmul.mubr.msk.bf16.gmra.mrb[20].mxu1 %vm403_vm1, %v704_v45  ;;  %v640_v31 = vmul.f32 %v1235_v16, %v592_v5 }
 0x2ac   :  { %v578_v36 = vsub.f32 %v546_v18, %v562_v24  ;;  %v639_v37 = vmul.f32 %v1237_v35, %v591_v19 }
 0x2ad   :  { %v577_v48 = vsub.f32 %v545_v21, %v561_v32  ;;  %v532_v50 = vpop.xlane.xlu1 %531  ;;  %v660_v53 = vmul.f32 %v1552_v22, %v640_v31 }
 0x2ae   :  { %v1239_v54 = vpop.eup %1238  ;;  %v610_v59 = vadd.f32 1e-05, %v578_v36  ;;  %v548_v62 = vmul.f32 0.03125, %v532_v50  ;;  %v529_v40 = vpop.xlane.xlu0 %528  ;;  %v659_v46 = vmul.f32 %v1552_v22, %v639_v37  ;;  %v594_v50 = vsub.f32 %v1513_v63, %v1647_v49 }
 0x2af   :  { %v1241_v5 = vpop.eup %1240  ;;  %v609_v45 = vadd.f32 1e-05, %v577_v48  ;;  %v547_v39 = vmul.f32 0.03125, %v529_v40  ;;  %v638_v55 = vmul.f32 %v1239_v54, %v590_v51  ;;  %v1681_v16 = vadd.f32 %v1565_v47, %v660_v53 }
 0x2b0   :  { %1242 = vrsqrt.f32 %v610_v59  ;;  %v580_v41 = vsub.f32 %v548_v62, %v564_v57  ;;  %v637_v61 = vmul.f32 %v1241_v5, %v589_v28  ;;  %v1685_v18 = vadd.f32 %v1565_v47, %v659_v46 }
 0x2b1   :  { %1244 = vrsqrt.f32 %v609_v45  ;;  %v579_v19 = vsub.f32 %v547_v39, %v563_v7  ;;  %v658_v24 = vmul.f32 %v1552_v22, %v638_v55  ;;  %v696_v51 = vmax.f32 %v1681_v16, 0.0 }
 0x2b2   :  { %v612_v30 = vadd.f32 1e-05, %v580_v41  ;;  %v657_v35 = vmul.f32 %v1552_v22, %v637_v61  ;;  %v695_v37 = vmax.f32 %v1685_v18, 0.0  ;;  %v593_v57 = vsub.f32 %v1518_v1, %v1650_v56 }
 0x2b3   :  { %v611_v32 = vadd.f32 1e-05, %v579_v19  ;;  %v1689_v21 = vadd.f32 %v1565_v47, %v658_v24  ;;  %v596_v46 = vsub.f32 %v1502_v58, %v1664_v20  ;;  %v595_v5 = vsub.f32 %v1506_v60, %v467_v34 }
 0x2b4   :  { %1246 = vrsqrt.f32 %v612_v30  ;;  %v1692_v31 = vadd.f32 %v1565_v47, %v657_v35  ;;  %v706_v53 = vpack.c.bf16 %v696_v51, %v695_v37 }
 0x2b5   :  { %1248 = vrsqrt.f32 %v611_v32  ;;  %v694_v36 = vmax.f32 %v1689_v21, 0.0 }
 0x2b6   :  { %v693_v28 = vmax.f32 %v1692_v31, 0.0 }
 0x2b8   :  { %v705_v48 = vpack.c.bf16 %v694_v36, %v693_v28 }
 0x2ba   :  { %v1243_v54 = vpop.eup %1242  ;;  %1140 = vmatprep.mubr.msk.bf16.mxu1 %vm403_vm1, %v705_v48 }
 0x2bb   :  { %v1245_v59 = vpop.eup %1244  ;;  %1141 = vmatmul.mubr.msk.bf16.gmra.mrb[24].mxu1 %vm403_vm1, %v706_v53  ;;  %v642_v62 = vmul.f32 %v1243_v54, %v594_v50 }
 0x2bc   :  { %v641_v40 = vmul.f32 %v1245_v59, %v593_v57 }
 0x2bd   :  { %v662_v63 = vmul.f32 %v1552_v22, %v642_v62 }
 0x2be   :  { %v1247_v49 = vpop.eup %1246  ;;  %v661_v7 = vmul.f32 %v1552_v22, %v641_v40 }
 0x2bf   :  { %v1249_v45 = vpop.eup %1248  ;;  %v644_v39 = vmul.f32 %v1247_v49, %v596_v46  ;;  %v1718_v1 = vadd.f32 %v1565_v47, %v662_v63 }
 0x2c0   :  { %v643_v56 = vmul.f32 %v1249_v45, %v595_v5  ;;  %v1721_v55 = vadd.f32 %v1565_v47, %v661_v7 }
 0x2c1   :  { %v698_v41 = vmax.f32 %v1718_v1, 0.0  ;;  %v664_v58 = vmul.f32 %v1552_v22, %v644_v39 }
 0x2c2   :  { %v697_v20 = vmax.f32 %v1721_v55, 0.0  ;;  %v663_v61 = vmul.f32 %v1552_v22, %v643_v56 }
 0x2c3   :  { %v1728_v60 = vadd.f32 %v1565_v47, %v664_v58 }
 0x2c4   :  { %v707_v34 = vpack.c.bf16 %v698_v41, %v697_v20  ;;  %v1735_v19 = vadd.f32 %v1565_v47, %v663_v61 }
 0x2c5   :  { %v700_v24 = vmax.f32 %v1728_v60, 0.0 }
 0x2c6   :  { %1144 = vmatprep.mubr.msk.bf16.mxu1 %vm403_vm1, %v707_v34  ;;  %v699_v30 = vmax.f32 %v1735_v19, 0.0 }
 0x2c8   :  { %v708_v22 = vpack.c.bf16 %v700_v24, %v699_v30 }
 0x2ca   :  { %1145 = vmatmul.mubr.msk.bf16.gmra.mrb[28].mxu1 %vm403_vm1, %v708_v22 }
 0x2cb   :  { %1176 = vmatprep.mubr.bf16.mxu1 %v1378_v14 }
 0x36e   :  { %v1134_v35 = vpop.f32.mrb[16].mxu1 }
 0x36f   :  { %v783_v32 = vpop.f32.mrb[17].mxu1 }
 0x370   :  { %v1135_v48 = vpop.f32.mrb[18].mxu1 }
 0x371   :  { %v847_v47 = vpack.c.bf16 %v1135_v48, %v1134_v35  ;;  %v786_v50 = vpop.f32.mrb[19].mxu1  ;;  %v856_v35 = vsub.s32 3, %v1396_v42 }
 0x372   :  { %v846_v53 = vpack.c.bf16 %v786_v50, %v783_v32 }
 0x373   :  { %v857_v32 = vrot.slane %v1402_v44, %v856_v35 }
 0x374   :  { %1148 = vmatprep.subr.bf16.mxu0 %v846_v53  ;;  %1180 = vmatprep.subr.bf16.mxu1 %v846_v53 }
 0x375   :  { %1149 = vmatpush3.bf16.msra.mxu0 %v846_v53  ;;  %1188 = vmatpush3.bf16.msra.mxu1 %v846_v53 }
 0x376   :  { %1150 = vmatprep.subr.bf16.mxu0 %v847_v47  ;;  %1181 = vmatprep.subr.bf16.mxu1 %v847_v47 }
 0x379   :  { %1151 = vmatpush3.bf16.msra.mxu0 %v847_v47  ;;  %1189 = vmatpush3.bf16.msra.mxu1 %v847_v47 }
 0x37e   :  { %v1138_v54 = vpop.f32.mrb[20].mxu1 }
 0x37f   :  { %v799_v57 = vpop.f32.mrb[21].mxu1 }
 0x380   :  { %v1139_v59 = vpop.f32.mrb[22].mxu1 }
 0x381   :  { %v849_v62 = vpack.c.bf16 %v1139_v59, %v1138_v54  ;;  %v802_v40 = vpop.f32.mrb[23].mxu1 }
 0x382   :  { %v848_v14 = vpack.c.bf16 %v802_v40, %v799_v57 }
 0x384   :  { %1152 = vmatprep.subr.bf16.mxu0 %v848_v14  ;;  %1182 = vmatprep.subr.bf16.mxu1 %v848_v14 }
 0x385   :  { %1153 = vmatpush3.bf16.msra.mxu0 %v848_v14  ;;  %1190 = vmatpush3.bf16.msra.mxu1 %v848_v14 }
 0x386   :  { %1154 = vmatprep.subr.bf16.mxu0 %v849_v62  ;;  %1183 = vmatprep.subr.bf16.mxu1 %v849_v62 }
 0x389   :  { %1155 = vmatpush3.bf16.msra.mxu0 %v849_v62  ;;  %1191 = vmatpush3.bf16.msra.mxu1 %v849_v62 }
 0x38e   :  { %v1142_v46 = vpop.f32.mrb[24].mxu1 }
 0x38f   :  { %v815_v63 = vpop.f32.mrb[25].mxu1 }
 0x390   :  { %v1143_v49 = vpop.f32.mrb[26].mxu1 }
 0x391   :  { %v851_v5 = vpack.c.bf16 %v1143_v49, %v1142_v46  ;;  %v818_v7 = vpop.f32.mrb[27].mxu1 }
 0x392   :  { %v850_v45 = vpack.c.bf16 %v818_v7, %v815_v63 }
 0x394   :  { %1156 = vmatprep.subr.bf16.mxu0 %v850_v45  ;;  %1184 = vmatprep.subr.bf16.mxu1 %v850_v45 }
 0x395   :  { %1157 = vmatpush3.bf16.msra.mxu0 %v850_v45  ;;  %1192 = vmatpush3.bf16.msra.mxu1 %v850_v45 }
 0x396   :  { %1158 = vmatprep.subr.bf16.mxu0 %v851_v5  ;;  %1185 = vmatprep.subr.bf16.mxu1 %v851_v5 }
 0x399   :  { %1159 = vmatpush3.bf16.msra.mxu0 %v851_v5  ;;  %1193 = vmatpush3.bf16.msra.mxu1 %v851_v5 }
 0x39d   :  { %v1146_v39 = vpop.f32.mrb[28].mxu1 }
 0x39e   :  { %v831_v56 = vpop.f32.mrb[29].mxu1 }
 0x39f   :  { %v1147_v58 = vpop.f32.mrb[30].mxu1 }
 0x3a0   :  { %v853_v61 = vpack.c.bf16 %v1147_v58, %v1146_v39  ;;  %v834_v34 = vpop.f32.mrb[31].mxu1 }
 0x3a1   :  { %v852_v22 = vpack.c.bf16 %v834_v34, %v831_v56 }
 0x3a3   :  { %1160 = vmatprep.subr.bf16.mxu0 %v852_v22  ;;  %1186 = vmatprep.subr.bf16.mxu1 %v852_v22 }
 0x3a4   :  { %1161 = vmatpush3.bf16.msra.mxu0 %v852_v22  ;;  %1194 = vmatpush3.bf16.msra.mxu1 %v852_v22 }
 0x3a5   :  { %1162 = vmatprep.subr.bf16.mxu0 %v853_v61  ;;  %1187 = vmatprep.subr.bf16.mxu1 %v853_v61 }
 0x3a8   :  { %1163 = vmatpush3.bf16.msra.mxu0 %v853_v61  ;;  %1195 = vmatpush3.bf16.msra.mxu1 %v853_v61 }
 0x3ab   :  { %1165 = vmatmul.mubr.bf16.vlgmr.msra.gmra.mrb[16].mxu0 %v1349_v9  ;;  %1177 = vmatmul.mubr.bf16.vlgmr.msra.gmra.mrb[32].mxu1 %v1385_v15 }
 0x3ac   :  { %1168 = vmatprep.mubr.bf16.mxu0 %v1354_v10 }
 0x3b3   :  { %1169 = vmatmul.mubr.bf16.gmra.mrb[20].mxu0 %v1361_v11 }
 0x3b4   :  { %1172 = vmatprep.mubr.bf16.mxu0 %v1366_v12 }
 0x3bb   :  { %1173 = vmatmul.mubr.bf16.gmra.mrb[24].mxu0 %v1373_v13 }
 0x47e   :  { %v1166_v48 = vpop.f32.mrb[16].mxu0  ;;  %v1178_v47 = vpop.f32.mrb[32].mxu1 }
 0x47f   :  { %v901_v50 = vadd.f32 %v1166_v48, %v857_v32  ;;  %v949_v53 = vadd.f32 %v1178_v47, %v857_v32  ;;  %v892_v54 = vpop.f32.mrb[17].mxu0  ;;  %v940_v9 = vpop.f32.mrb[33].mxu1 }
 0x480   :  { %v893_v57 = vadd.f32 %v892_v54, %v857_v32  ;;  %v941_v15 = vadd.f32 %v940_v9, %v857_v32  ;;  %v1167_v59 = vpop.f32.mrb[18].mxu0  ;;  %v1179_v10 = vpop.f32.mrb[34].mxu1 }
 0x481   :  { %v957_v11 = vadd.f32 %v901_v50, %v687_v43  ;;  %v969_v12 = vadd.f32 %v949_v53, %v699_v30  ;;  %v904_v13 = vadd.f32 %v1167_v59, %v857_v32  ;;  %v952_v42 = vadd.f32 %v1179_v10, %v857_v32  ;;  %v895_v62 = vpop.f32.mrb[19].mxu0  ;;  %v943_v44 = vpop.f32.mrb[35].mxu1 }
 0x482   :  { %v955_v40 = vadd.f32 %v893_v57, %v685_v38  ;;  %v967_v14 = vadd.f32 %v941_v15, %v697_v20  ;;  %v896_v46 = vadd.f32 %v895_v62, %v857_v32  ;;  %v944_v63 = vadd.f32 %v943_v44, %v857_v32 }
 0x483   :  { %973 = vst.msk [vmem:[%s1855_s5 + $0x10] sm:$0xff] %vm403_vm1, %v957_v11  ;;  %985 = vst.msk [vmem:[%s1855_s5 + $0x70] sm:$0xff] %vm403_vm1, %v969_v12  ;;  %v958_v23 = vadd.f32 %v904_v13, %v688_v29  ;;  %v970_v27 = vadd.f32 %v952_v42, %v700_v24 }
 0x484   :  { %971 = vst.msk [vmem:[%s1855_s5] sm:$0xff] %vm403_vm1, %v955_v40  ;;  %983 = vst.msk [vmem:[%s1855_s5 + $0x60] sm:$0xff] %vm403_vm1, %v967_v14  ;;  %v956_v38 = vadd.f32 %v896_v46, %v686_v33  ;;  %v968_v3 = vadd.f32 %v944_v63, %v698_v41 }
 0x485   :  { %974 = vst.msk [vmem:[%s1855_s5 + $0x18] sm:$0xff] %vm403_vm1, %v958_v23  ;;  %986 = vst.msk [vmem:[%s1855_s5 + $0x78] sm:$0xff] %vm403_vm1, %v970_v27 }
 0x486   :  { %972 = vst.msk [vmem:[%s1855_s5 + $0x8] sm:$0xff] %vm403_vm1, %v956_v38  ;;  %984 = vst.msk [vmem:[%s1855_s5 + $0x68] sm:$0xff] %vm403_vm1, %v968_v3  ;;  %v1170_v25 = vpop.f32.mrb[20].mxu0 }
 0x487   :  { %v917_v29 = vadd.f32 %v1170_v25, %v857_v32  ;;  %v908_v33 = vpop.f32.mrb[21].mxu0 }
 0x488   :  { %v909_v43 = vadd.f32 %v908_v33, %v857_v32  ;;  %v1171_v1 = vpop.f32.mrb[22].mxu0 }
 0x489   :  { %v961_v55 = vadd.f32 %v917_v29, %v691_v6  ;;  %v920_v41 = vadd.f32 %v1171_v1, %v857_v32  ;;  %v911_v20 = vpop.f32.mrb[23].mxu0 }
 0x48a   :  { %v959_v60 = vadd.f32 %v909_v43, %v689_v2  ;;  %v912_v19 = vadd.f32 %v911_v20, %v857_v32 }
 0x48b   :  { %977 = vst.msk [vmem:[%s1855_s5 + $0x30] sm:$0xff] %vm403_vm1, %v961_v55  ;;  %v962_v24 = vadd.f32 %v920_v41, %v692_v17 }
 0x48c   :  { %975 = vst.msk [vmem:[%s1855_s5 + $0x20] sm:$0xff] %vm403_vm1, %v959_v60  ;;  %v960_v52 = vadd.f32 %v912_v19, %v690_v0 }
 0x48d   :  { %978 = vst.msk [vmem:[%s1855_s5 + $0x38] sm:$0xff] %vm403_vm1, %v962_v24 }
 0x48e   :  { %976 = vst.msk [vmem:[%s1855_s5 + $0x28] sm:$0xff] %vm403_vm1, %v960_v52  ;;  %v1174_v26 = vpop.f32.mrb[24].mxu0 }
 0x48f   :  { %v933_v8 = vadd.f32 %v1174_v26, %v857_v32  ;;  %v924_v6 = vpop.f32.mrb[25].mxu0 }
 0x490   :  { %v925_v17 = vadd.f32 %v924_v6, %v857_v32  ;;  %v1175_v2 = vpop.f32.mrb[26].mxu0 }
 0x491   :  { %v965_v30 = vadd.f32 %v933_v8, %v695_v37  ;;  %v936_v4 = vadd.f32 %v1175_v2, %v857_v32  ;;  %v927_v0 = vpop.f32.mrb[27].mxu0 }
 0x492   :  { %v963_v49 = vadd.f32 %v925_v17, %v693_v28  ;;  %v928_v5 = vadd.f32 %v927_v0, %v857_v32 }
 0x493   :  { %981 = vst.msk [vmem:[%s1855_s5 + $0x50] sm:$0xff] %vm403_vm1, %v965_v30  ;;  %v966_v7 = vadd.f32 %v936_v4, %v696_v51 }
 0x494   :  { %979 = vst.msk [vmem:[%s1855_s5 + $0x40] sm:$0xff] %vm403_vm1, %v963_v49  ;;  %v964_v18 = vadd.f32 %v928_v5, %v694_v36 }
 0x495   :  { %982 = vst.msk [vmem:[%s1855_s5 + $0x58] sm:$0xff] %vm403_vm1, %v966_v7 }
 0x496   :  { %980 = vst.msk [vmem:[%s1855_s5 + $0x48] sm:$0xff] %vm403_vm1, %v964_v18 }
 0x497   :  { %991 = vsyncpa [#allocation3], 1 }

</bundles_post_ra>
